<compile_context>
chip_gen: v6e
topology: v6e:2x2x1
jax: 0.10.0
libtpu: 0.0.40
codegen_flags: <defaults>
</compile_context>

<pallas_src>
import functools
import math

import jax
import jax.numpy as jnp
from jax.experimental import pallas as pl
from jax.experimental.pallas import tpu as pltpu


def _round_up(a, b):
    return (a + b - 1) // b * b


def _label_smoothing_kernel(x_ref, tgt_ref, out_ref, *,
                            n_real, padding_idx,
                            confidence, low, row_const):
    """Per-row KL(true_dist || exp(x)) via two lane reductions (no EUP work)."""
    x = x_ref[...].astype(jnp.float32)          # (tile_n, V) log-probs
    tgt = tgt_ref[...]                          # (tile_n, 1) int32 class ids
    tile_n, v = x.shape

    # (1, V) column iota; broadcasts inside the compare (no full int32 tile).
    col = jax.lax.broadcasted_iota(jnp.int32, (1, v), 1)

    # Row-wise sum over all real columns and the target-column pick.
    s_all = jnp.sum(x, axis=1, keepdims=True)                          # (tile_n, 1)
    x_tgt = jnp.sum(jnp.where(col == tgt, x, 0.0), axis=1, keepdims=True)
    x_pad = x[:, padding_idx:padding_idx + 1]                          # (tile_n, 1)

    loss = row_const - (confidence - low) * x_tgt - low * s_all + low * x_pad

    # Zero rows past the real row count (partial last block) and rows whose
    # target is the padding index; jnp.where is a select so OOB garbage
    # (even NaN/Inf) cannot leak through.
    row = (jax.lax.broadcasted_iota(jnp.int32, (tile_n, 1), 0)
           + pl.program_id(0) * tile_n)
    valid = jnp.logical_and(row < n_real, tgt != padding_idx)
    out_ref[...] = jnp.where(valid, loss, 0.0)


def label_smoothing_loss(x, target, *, size, padding_idx, smoothing,
                         tile_n=None):
    """x: (N, size) float log-probs, target: (N,) int. Returns scalar loss."""
    N, V = x.shape
    assert V == size

    confidence = 1.0 - smoothing
    low = smoothing / (size - 2)
    conf_log_conf = confidence * math.log(confidence) if confidence > 0.0 else 0.0
    low_log_low = low * math.log(low) if low > 0.0 else 0.0
    row_const = conf_log_conf + (size - 2) * low_log_low

    itemsize = jnp.dtype(x.dtype).itemsize
    sub = {4: 8, 2: 16, 1: 32}.get(itemsize, 8)      # sublane tile multiple

    # Chip-aware VMEM budget (v5e/v6e: 128 MiB physical VMEM, v7x: 64 MiB).
    try:
        vmem_cap = getattr(pltpu.get_tpu_info(), "vmem_capacity_bytes",
                           64 * 1024 * 1024)
    except Exception:
        vmem_cap = 64 * 1024 * 1024
    if vmem_cap >= 96 * 1024 * 1024:                 # v5e / v6e
        block_bytes, vmem_limit = 12 * 1024 * 1024, 64 * 1024 * 1024
    else:                                            # v7x (or unknown: be safe)
        block_bytes, vmem_limit = 8 * 1024 * 1024, 48 * 1024 * 1024

    row_bytes = _round_up(V, 128) * itemsize
    if tile_n is None:
        tile_n = max(sub, min(2048, (block_bytes // row_bytes) // sub * sub))
    # Keep the single "parallel" grid axis >= 2 steps so v7x megacore shards it
    # (one extra ~0.35us step is negligible on single-TC parts).
    half_rows = max(sub, _round_up((N + 1) // 2, sub))
    tile_n = max(sub, (min(tile_n, half_rows) // sub) * sub)

    grid = -(-N // tile_n)                           # cdiv
    tgt2d = target.astype(jnp.int32).reshape(N, 1)

    kernel = functools.partial(
        _label_smoothing_kernel,
        n_real=N, padding_idx=padding_idx,
        confidence=confidence, low=low, row_const=row_const)

    row_losses = pl.pallas_call(
        kernel,
        out_shape=jax.ShapeDtypeStruct((grid * tile_n, 1), jnp.float32),
        grid_spec=pltpu.PrefetchScalarGridSpec(
            num_scalar_prefetch=0,
            grid=(grid,),
            in_specs=[
                pl.BlockSpec((tile_n, V), lambda i: (i, 0)),
                pl.BlockSpec((tile_n, 1), lambda i: (i, 0)),
            ],
            out_specs=pl.BlockSpec((tile_n, 1), lambda i: (i, 0)),
        ),
        compiler_params=pltpu.CompilerParams(
            dimension_semantics=("parallel",),
            vmem_limit_bytes=vmem_limit),
    )(x, tgt2d)

    return jnp.sum(row_losses)


def _reference(x, target, *, size, padding_idx, smoothing):
    """Pure-JAX mirror of the PyTorch forward, for correctness checking."""
    N, V = x.shape
    confidence = 1.0 - smoothing
    low = smoothing / (size - 2)
    col = jnp.arange(V)[None, :]
    tgt = target[:, None]
    td = jnp.full((N, V), low, jnp.float32)
    td = jnp.where(col == tgt, confidence, td)
    td = jnp.where(col == padding_idx, 0.0, td)
    td = jnp.where(tgt == padding_idx, 0.0, td)
    term = jnp.where(td > 0.0, td * (jnp.log(td) - x), 0.0)
    return jnp.sum(term)


if __name__ == "__main__":
    # Module config (deterministic, in-script)
    SIZE = 32          # vocab size == x.size(1)
    PADDING_IDX = 0
    SMOOTHING = 0.1

    N = 16             # number of tokens

    key = jax.random.PRNGKey(0)
    kx, kt = jax.random.split(key)

    # x must be log-probabilities (KLDivLoss convention) -> log_softmax of logits
    logits = jax.random.normal(kx, (N, SIZE), dtype=jnp.float32)
    x = jax.nn.log_softmax(logits, axis=-1)

    # targets in [0, SIZE); force a couple of padding tokens to exercise masking
    target = jax.random.randint(kt, (N,), 0, SIZE, dtype=jnp.int32)
    target = target.at[3].set(PADDING_IDX)
    target = target.at[11].set(PADDING_IDX)

    loss = label_smoothing_loss(x, target,
                                size=SIZE,
                                padding_idx=PADDING_IDX,
                                smoothing=SMOOTHING)
    loss = jax.block_until_ready(loss)

    ref = _reference(x, target,
                     size=SIZE,
                     padding_idx=PADDING_IDX,
                     smoothing=SMOOTHING)
    assert jnp.allclose(loss, ref, rtol=1e-5, atol=1e-5), (loss, ref)

    print("KERNEL_OK")
</pallas_src>

<mosaic_0001>
module attributes {stable_mosaic.version = 11 : i64} {
  func.func @_label_smoothing_kernel(%arg0: i32, %arg1: memref<8x32xf32, #tpu.memory_space<vmem>>, %arg2: memref<8x1xi32, #tpu.memory_space<vmem>>, %arg3: memref<8x1xf32, #tpu.memory_space<vmem>>) attributes {dimension_semantics = [#tpu.dimension_semantics<parallel>], iteration_bounds = array<i64: 2>, scalar_prefetch = 0 : i64, scratch_operands = 0 : i64, tpu.core_type = #tpu.core_type<tc>, window_params = [{transform_indices = @transform_0, window_bounds = array<i64: 8, 32>}, {transform_indices = @transform_1, window_bounds = array<i64: 8, 1>}, {transform_indices = @transform_2, window_bounds = array<i64: 8, 1>}]} {
    %c0 = arith.constant 0 : index
    %c0_0 = arith.constant 0 : index
    %0 = vector.load %arg1[%c0, %c0_0] : memref<8x32xf32, #tpu.memory_space<vmem>>, vector<8x32xf32>
    %c0_1 = arith.constant 0 : index
    %c0_2 = arith.constant 0 : index
    %1 = vector.load %arg2[%c0_1, %c0_2] : memref<8x1xi32, #tpu.memory_space<vmem>>, vector<8x1xi32>
    %2 = tpu.iota {dimensions = array<i32: 1>} : vector<1x32xi32>
    %cst = arith.constant dense<0.000000e+00> : vector<8xf32>
    %3 = vector.multi_reduction <add>, %0, %cst [1] : vector<8x32xf32> to vector<8xf32>
    %4 = vector.shape_cast %3 : vector<8xf32> to vector<8x1xf32>
    %5 = vector.broadcast %2 : vector<1x32xi32> to vector<8x32xi32>
    %6 = vector.broadcast %1 : vector<8x1xi32> to vector<8x32xi32>
    %7 = arith.cmpi eq, %5, %6 : vector<8x32xi32>
    %cst_3 = arith.constant 0.000000e+00 : f32
    %8 = vector.broadcast %cst_3 : f32 to vector<8x32xf32>
    %9 = arith.select %7, %0, %8 : vector<8x32xi1>, vector<8x32xf32>
    %cst_4 = arith.constant dense<0.000000e+00> : vector<8xf32>
    %10 = vector.multi_reduction <add>, %9, %cst_4 [1] : vector<8x32xf32> to vector<8xf32>
    %11 = vector.shape_cast %10 : vector<8xf32> to vector<8x1xf32>
    %12 = vector.extract_strided_slice %0 {offsets = [0, 0], sizes = [8, 1], strides = [1, 1]} : vector<8x32xf32> to vector<8x1xf32>
    %cst_5 = arith.constant 0.896666646 : f32
    %13 = vector.broadcast %cst_5 : f32 to vector<8x1xf32>
    %14 = arith.mulf %13, %11 : vector<8x1xf32>
    %cst_6 = arith.constant -0.665202737 : f32
    %15 = vector.broadcast %cst_6 : f32 to vector<8x1xf32>
    %16 = arith.subf %15, %14 : vector<8x1xf32>
    %cst_7 = arith.constant 0.00333333341 : f32
    %17 = vector.broadcast %cst_7 : f32 to vector<8x1xf32>
    %18 = arith.mulf %17, %4 : vector<8x1xf32>
    %19 = arith.subf %16, %18 : vector<8x1xf32>
    %cst_8 = arith.constant 0.00333333341 : f32
    %20 = vector.broadcast %cst_8 : f32 to vector<8x1xf32>
    %21 = arith.mulf %20, %12 : vector<8x1xf32>
    %22 = arith.addf %19, %21 : vector<8x1xf32>
    %23 = tpu.iota {dimensions = array<i32: 0>} : vector<8x1xi32>
    %c8_i32 = arith.constant 8 : i32
    %24 = arith.muli %arg0, %c8_i32 : i32
    %25 = vector.broadcast %24 : i32 to vector<8x1xi32>
    %26 = arith.addi %23, %25 : vector<8x1xi32>
    %c16_i32 = arith.constant 16 : i32
    %27 = vector.broadcast %c16_i32 : i32 to vector<8x1xi32>
    %28 = arith.cmpi slt, %26, %27 : vector<8x1xi32>
    %c0_i32 = arith.constant 0 : i32
    %29 = vector.broadcast %c0_i32 : i32 to vector<8x1xi32>
    %30 = arith.cmpi ne, %1, %29 : vector<8x1xi32>
    %31 = arith.andi %28, %30 : vector<8x1xi1>
    %cst_9 = arith.constant 0.000000e+00 : f32
    %32 = vector.broadcast %cst_9 : f32 to vector<8x1xf32>
    %33 = arith.select %31, %22, %32 : vector<8x1xi1>, vector<8x1xf32>
    %c0_10 = arith.constant 0 : index
    %c0_11 = arith.constant 0 : index
    %34 = vector.load %arg3[%c0_10, %c0_11] : memref<8x1xf32, #tpu.memory_space<vmem>>, vector<8x1xf32>
    tpu.vector_store %arg3[%c0_10, %c0_11], %33 {strides = array<i32>} : memref<8x1xf32, #tpu.memory_space<vmem>>, vector<8x1xf32>,
    return
  }
  func.func @transform_0(%arg0: i32) -> (i32, i32) {
    %c0_i32 = arith.constant 0 : i32
    %c0_i32_0 = arith.constant 0 : i32
    return %arg0, %c0_i32 : i32, i32
  }
  func.func @transform_1(%arg0: i32) -> (i32, i32) {
    %c0_i32 = arith.constant 0 : i32
    %c0_i32_0 = arith.constant 0 : i32
    return %arg0, %c0_i32 : i32, i32
  }
  func.func @transform_2(%arg0: i32) -> (i32, i32) {
    %c0_i32 = arith.constant 0 : i32
    %c0_i32_0 = arith.constant 0 : i32
    return %arg0, %c0_i32 : i32, i32
  }
}

</mosaic_0001>

<bundles_post_ra>
// kernel: tpu_custom_call.1
= control target key start
LH: loop header
LB: loop body
LE: loop exit
PB: predicated region body
PF: predicated region fallthrough
CT: control target
= control target key end

     0   :  { %s299_s9 = smov 0   ;;  %s330_s0 = inlined_call_operand.vmem [shape: f32[16,32], index: 0, kind: input, shape index: {}]   ;;  %s331_s1 = inlined_call_operand.vmem [shape: s32[16,1], index: 1, kind: input, shape index: {}]   ;;  %s332_s2 = inlined_call_operand.vmem [shape: f32[16,1], index: 2, kind: output, shape index: {}]  }
   0x1 LB: > { %s254_s10 = sadd.s32 4294967295, %s281_s9   ;;  %p258_p0 = scmp.ge.s32.totalorder %s281_s9, 1  ;;  %s281_s9 = sphi %s299_s9, %s12_s9  }
   0x2   : > { %p120_p1 = scmp.lt.s32.totalorder %s281_s9, 3 }
   0x4   : > { %p121_p2 = pnand %p258_p0, %p120_p1 }
   0x5   : > { %p144_p3 = scmp.lt.s32.totalorder (!%p121_p2), %s254_s10, 1  ;;  %s262_s11 = sshll.u32 (!%p121_p2), %s254_s10, 3 }
   0x6   : > { %124 = sbr.rel (%p121_p2) target bundleno = 290 (0x122), region = 28 }
   0xb   : > { %v158_v0 = vlaneseq  ;;  %v283_v1 = vmov 0   ;;  %v181_v2 = vstv %s262_s11  ;;  %s336_s10 = smov (!%p144_p3, %s254_s10), 1  ;;  %vm160_vm2 = vcmask 261120  }
   0xc   : > { %274 = vset.pattern.permute.xlu0 %v283_v1  ;;  %s307_s12 = sshll.u32 %s336_s10, 3  ;;  %vm187_vm5 = vcmask 7168  }
   0xd   : > { %v179_v3 = vshrl.u32 %v158_v0, 7  ;;  %s151_s15 = scalar_lea.vmem %s331_s1, %s307_s12  ;;  %s147_s18 = scalar_lea.vmem %s330_s0, %s307_s12  ;;  %v159_v9 = vand.u32 127, %v158_v0 }
   0xe   : > { %v157_v5 = vld [vmem:[%s151_s15] sm:$0xff]  ;;  %s155_s21 = scalar_lea.vmem %s332_s2, %s307_s12 }
   0xf   : > { %v182_v4 = vadd.s32 %v181_v2, %v179_v3  ;;  %165 = vperm.xlu0 %274, %v157_v5   ;;  %vm184_vm1 = vcmp.ne.s32.totalorder %v157_v5, 0  ;;  %v156_v6 = vld [vmem:[%s147_s18] sm:$0xff] }
  0x10   : > { %v161_v8 = vsel %vm160_vm2, %v156_v6, 0.0  ;;  %v176_v18 = vmul.f32 0.0033333334, %v156_v6 }
  0x11   : > { %vm183_vm0 = vcmp.lt.s32.totalorder %v182_v4, 16  ;;  %162 = vadd.xlane.f32.xlu1 %v161_v8 }
  0x12   : > { %vm317_vm3 = vmand %vm183_vm0, %vm184_vm1 }
  0x8a   : > { %v166_v10 = vpop.permute.xlu0 %165 }
  0x8b   : > { %vm167_vm4 = vcmp.eq.s32.totalorder %v159_v9, %v166_v10 }
  0x8c   : > { %v168_v11 = vsel %vm167_vm4, %v156_v6, 0.0 }
  0x8d   : > { %v169_v12 = vsel %vm160_vm2, %v168_v11, 0.0 }
  0x8e   : > { %170 = vadd.xlane.f32.xlu0 %v169_v12 }
  0x9a   : > { %v163_v13 = vpop.xlane.xlu1 %162 }
  0x9b   : > { %v174_v16 = vmul.f32 0.0033333334, %v163_v13 }
 0x117   : > { %v171_v14 = vpop.xlane.xlu0 %170 }
 0x118   : > { %v172_v15 = vmul.f32 0.89666665, %v171_v14 }
 0x11a   : > { %v173_v17 = vsub.f32 -0.66520274, %v172_v15 }
 0x11c   : > { %v175_v19 = vsub.f32 %v173_v17, %v174_v16 }
 0x11e   : > { %v177_v20 = vadd.f32 %v176_v18, %v175_v19 }
 0x120   : > { %v186_v21 = vsel %vm317_vm3, %v177_v20, 0.0 }
 0x121   : > { %188 = vst.msk [vmem:[%s155_s21] sm:$0xff] %vm187_vm5, %v186_v21 }
 0x122 PF: > { %s12_s9 = sadd.s32 1, %s281_s9  }
 0x123   : > { %p9_p4 = scmp.ge.s32.totalorder %s12_s9, 4  }
 0x125   :  { %11 = sbr.rel (!%p9_p4) target bundleno = 1 (0x1), region = 61 }

</bundles_post_ra>
